<compile_context>
chip_gen: v7x
topology: tpu7x:2x2x1
jax: 0.10.0
libtpu: 0.0.40
codegen_flags: <defaults>
</compile_context>

<pallas_src>
import jax
import jax.numpy as jnp
from jax.experimental import pallas as pl
from jax.experimental.pallas import tpu as pltpu

C1 = 16   # conv1 out_channels (fixed inside the torch module)
K = 3     # kernel_size for both convs

# TODO(synk): self.norm1 = torch.nn.BatchNorm1d() is never used in forward() (and is ill-formed
# in PyTorch anyway), so it is intentionally omitted here.


def cnn_encoder_kernel(x_ref, w1_ref, b1_ref, w2_ref, b2_ref, m_ref, o_ref):
    # conv1 (in_channels=1, k=3, pad=1) as a banded matmul: (tb, L) @ (L, L*C1), f32 accumulation.
    x = x_ref[...].astype(jnp.bfloat16)                                     # (tb, L)
    h = jnp.dot(x, w1_ref[...], preferred_element_type=jnp.float32)         # (tb, L*C1) f32
    h = jnp.maximum(h + b1_ref[...], 0.0).astype(jnp.bfloat16)              # bias + ReLU, bf16 once

    # conv2 (C1 -> Cout, k=3, pad=1) as a banded matmul: (tb, L*C1) @ (L*C1, L*Cout).
    y = jnp.dot(h, w2_ref[...], preferred_element_type=jnp.float32)         # (tb, L*Cout) f32
    y = jnp.maximum(y + b2_ref[...], 0.0).astype(jnp.bfloat16)              # bias + ReLU, bf16 once

    # mean over L folded into a matmul against a 128-lane-padded averaging matrix
    # -> lane-dense, unmasked output store.
    o_ref[...] = jnp.dot(y, m_ref[...], preferred_element_type=jnp.float32)  # (tb, Cout_pad) f32


def _round_up(n, m):
    return -(-n // m) * m


def _vmem_plan(L, c1, cout, cout_p):
    """Pick vmem_limit_bytes and a tile budget from the chip's physical VMEM."""
    # Resident weight bytes (x2: Pallas double-buffers inputs even with constant index maps).
    wbytes = 2 * ((L * L * c1) * 2 + (L * c1 * L * cout) * 2 + (L * cout * cout_p) * 2
                  + (L * c1) * 4 + (L * cout) * 4)
    cap = 64 * 1024 * 1024            # conservative fallback = v7x per-TC physical VMEM
    try:
        cap = int(getattr(pltpu.get_tpu_info(), "vmem_capacity_bytes", cap))
    except Exception:
        pass
    if cap <= 64 * 1024 * 1024:       # v7x-class: 64 MiB physical per TensorCore
        limit = 44 * 1024 * 1024
    else:                             # v5e / v6e: 128 MiB physical
        limit = 80 * 1024 * 1024
    tile_budget = max(2 * 1024 * 1024, limit - wbytes - 8 * 1024 * 1024)
    return limit, tile_budget


def _choose_tb(B, L, c1, cout, cout_p, tile_budget):
    """Batch tile: big enough to amortize per-step overhead, small enough for VMEM."""
    lanes = 128
    Lp = _round_up(L, lanes)
    H1 = _round_up(L * c1, lanes)
    H2 = _round_up(L * cout, lanes)
    row = 2 * Lp * 4          # Pallas-managed x buffers (f32, lane padded, double buffered)
    row += 2 * cout_p * 4     # Pallas-managed output buffers
    row += Lp * 2             # bf16 copy of x
    row += H1 * (4 + 2)       # h f32 + h bf16
    row += H2 * (4 + 2)       # y f32 + y bf16
    cap = max(8, min(8192, (tile_budget // row) // 8 * 8))
    # Keep >= 2 grid steps whenever the batch allows: required to feed both v7x TensorCores via the
    # "parallel" axis, and costs only ~0.35us of per-step overhead on single-core v5e/v6e.
    half = _round_up(-(-B // 2), 8)
    return max(8, min(cap, half))


def cnn_encoder(x, w1, b1, w2, b2, *, tb=None):
    """x: (B, L) f32. w1: (16,1,3), b1: (16,), w2: (Cout,16,3), b2: (Cout,) (torch layout)."""
    x = x.astype(jnp.float32)
    B, L = x.shape
    Cout, c1, k = w2.shape
    assert w1.shape == (c1, 1, k)
    Cout_p = _round_up(Cout, 128)     # lane-dense output slab; sliced back in the wrapper

    # TODO(synk): the banded weights are O(L^2 * C1 * Cout); for large L fall back to per-tap
    # (K=3*C1) matmuls instead of this single-banded-matmul formulation.

    # ---- Build banded weights / tiled biases (plain-JAX glue, done once per weight set). ----
    l_in = jnp.arange(L)[:, None]
    l_out = jnp.arange(L)[None, :]
    tap = l_in - l_out + 1                       # which conv tap connects l_in -> l_out
    valid = (tap >= 0) & (tap <= k - 1)
    tap_c = jnp.clip(tap, 0, k - 1)

    w1_t = jnp.transpose(w1[:, 0, :], (1, 0)).astype(jnp.float32)       # (K, C1)
    W1 = jnp.where(valid[:, :, None], w1_t[tap_c], 0.0)                 # (L, L, C1)
    W1 = W1.reshape(L, L * c1).astype(jnp.bfloat16)                     # (L, L*C1)

    w2_t = jnp.transpose(w2, (2, 1, 0)).astype(jnp.float32)             # (K, C1, Cout)
    W2 = jnp.where(valid[:, :, None, None], w2_t[tap_c], 0.0)           # (L, L, C1, Cout)
    W2 = jnp.transpose(W2, (0, 2, 1, 3)).reshape(L * c1, L * Cout).astype(jnp.bfloat16)

    b1_t = jnp.tile(b1.astype(jnp.float32), L).reshape(1, L * c1)       # col l*C1+c -> b1[c]
    b2_t = jnp.tile(b2.astype(jnp.float32), L).reshape(1, L * Cout)     # col l*Cout+co -> b2[co]

    co_idx = jnp.tile(jnp.arange(Cout), L)                              # row l*Cout+co -> co
    M = (co_idx[:, None] == jnp.arange(Cout_p)[None, :]).astype(jnp.float32) / L
    M = M.astype(jnp.bfloat16)                                          # (L*Cout, Cout_p)

    vmem_limit, tile_budget = _vmem_plan(L, c1, Cout, Cout_p)
    if tb is None:
        tb = _choose_tb(B, L, c1, Cout, Cout_p, tile_budget)

    # Pad the batch so it tiles evenly (padded rows are computed and sliced off).
    B_pad = _round_up(B, tb)
    if B_pad != B:
        x = jnp.pad(x, ((0, B_pad - B), (0, 0)))

    out = pl.pallas_call(
        cnn_encoder_kernel,
        out_shape=jax.ShapeDtypeStruct((B_pad, Cout_p), jnp.float32),
        grid_spec=pltpu.PrefetchScalarGridSpec(
            num_scalar_prefetch=0,
            grid=(B_pad // tb,),
            in_specs=[
                pl.BlockSpec((tb, L), lambda i: (i, 0)),                  # x tile (only per-step DMA)
                pl.BlockSpec((L, L * c1), lambda i: (0, 0)),              # banded conv1 weight (resident)
                pl.BlockSpec((1, L * c1), lambda i: (0, 0)),              # tiled conv1 bias (resident)
                pl.BlockSpec((L * c1, L * Cout), lambda i: (0, 0)),       # banded conv2 weight (resident)
                pl.BlockSpec((1, L * Cout), lambda i: (0, 0)),            # tiled conv2 bias (resident)
                pl.BlockSpec((L * Cout, Cout_p), lambda i: (0, 0)),       # mean matrix (resident)
            ],
            out_specs=pl.BlockSpec((tb, Cout_p), lambda i: (i, 0)),
        ),
        compiler_params=pltpu.CompilerParams(
            dimension_semantics=("parallel",),
            vmem_limit_bytes=vmem_limit,
        ),
    )(x, W1, b1_t, W2, b2_t, M)
    return out[:B, :Cout]


def ref_forward(x, w1, b1, w2, b2):
    """Pure-JAX reference mirroring the PyTorch forward (NCL convs)."""
    xc = x[:, None, :]  # unsqueeze(1) -> (B, 1, L)
    h = jax.lax.conv_general_dilated(xc, w1, window_strides=(1,), padding=((1, 1),),
                                     dimension_numbers=('NCH', 'OIH', 'NCH'))
    h = jax.nn.relu(h + b1[None, :, None])
    y = jax.lax.conv_general_dilated(h, w2, window_strides=(1,), padding=((1, 1),),
                                     dimension_numbers=('NCH', 'OIH', 'NCH'))
    y = jax.nn.relu(y + b2[None, :, None])
    return y.mean(axis=2)


if __name__ == "__main__":
    L, Cout = 16, 32

    key = jax.random.PRNGKey(0)
    kx, k1w, k1b, k2w, k2b = jax.random.split(key, 5)

    # Deterministic init mimicking PyTorch Conv1d default uniform(-1/sqrt(fan_in), +1/sqrt(fan_in)).
    bound1 = 1.0 / (1 * K) ** 0.5
    w1 = jax.random.uniform(k1w, (C1, 1, K), jnp.float32, -bound1, bound1)
    b1 = jax.random.uniform(k1b, (C1,), jnp.float32, -bound1, bound1)
    bound2 = 1.0 / (C1 * K) ** 0.5
    w2 = jax.random.uniform(k2w, (Cout, C1, K), jnp.float32, -bound2, bound2)
    b2 = jax.random.uniform(k2b, (Cout,), jnp.float32, -bound2, bound2)

    # Case 1: batch divides the tile evenly.
    B = 16
    x = jax.random.normal(kx, (B, L), jnp.float32)
    out = jax.block_until_ready(cnn_encoder(x, w1, b1, w2, b2))
    expected = ref_forward(x, w1, b1, w2, b2)
    assert out.shape == (B, Cout), out.shape
    # Tolerance accounts for bf16 MXU inputs on all three matmuls (f32 accumulation everywhere).
    assert jnp.allclose(out, expected, atol=2e-2, rtol=2e-2), \
        float(jnp.max(jnp.abs(out - expected)))

    # Case 2: batch not divisible by the chosen tile (exercises zero-pad + slice path).
    B2 = 20
    x2 = jax.random.normal(jax.random.PRNGKey(1), (B2, L), jnp.float32)
    out2 = jax.block_until_ready(cnn_encoder(x2, w1, b1, w2, b2))
    expected2 = ref_forward(x2, w1, b1, w2, b2)
    assert out2.shape == (B2, Cout), out2.shape
    assert jnp.allclose(out2, expected2, atol=2e-2, rtol=2e-2), \
        float(jnp.max(jnp.abs(out2 - expected2)))

    print("KERNEL_OK")
</pallas_src>

<mosaic_0001>
module attributes {stable_mosaic.version = 11 : i64} {
  func.func @cnn_encoder_kernel(%arg0: i32, %arg1: memref<8x16xf32, #tpu.memory_space<vmem>>, %arg2: memref<16x256xbf16, #tpu.memory_space<vmem>>, %arg3: memref<1x256xf32, #tpu.memory_space<vmem>>, %arg4: memref<256x512xbf16, #tpu.memory_space<vmem>>, %arg5: memref<1x512xf32, #tpu.memory_space<vmem>>, %arg6: memref<512x128xbf16, #tpu.memory_space<vmem>>, %arg7: memref<8x128xf32, #tpu.memory_space<vmem>>) attributes {dimension_semantics = [#tpu.dimension_semantics<parallel>], iteration_bounds = array<i64: 2>, scalar_prefetch = 0 : i64, scratch_operands = 0 : i64, tpu.core_type = #tpu.core_type<tc>, window_params = [{transform_indices = @transform_0, window_bounds = array<i64: 8, 16>}, {pipeline_mode = #tpu.pipeline_mode<synchronous>, transform_indices = @transform_1, window_bounds = array<i64: 16, 256>}, {pipeline_mode = #tpu.pipeline_mode<synchronous>, transform_indices = @transform_2, window_bounds = array<i64: 1, 256>}, {pipeline_mode = #tpu.pipeline_mode<synchronous>, transform_indices = @transform_3, window_bounds = array<i64: 256, 512>}, {pipeline_mode = #tpu.pipeline_mode<synchronous>, transform_indices = @transform_4, window_bounds = array<i64: 1, 512>}, {pipeline_mode = #tpu.pipeline_mode<synchronous>, transform_indices = @transform_5, window_bounds = array<i64: 512, 128>}, {transform_indices = @transform_6, window_bounds = array<i64: 8, 128>}]} {
    %c0 = arith.constant 0 : index
    %c0_0 = arith.constant 0 : index
    %0 = vector.load %arg1[%c0, %c0_0] : memref<8x16xf32, #tpu.memory_space<vmem>>, vector<8x16xf32>
    %1 = arith.truncf %0 : vector<8x16xf32> to vector<8x16xbf16>
    %c0_1 = arith.constant 0 : index
    %c0_2 = arith.constant 0 : index
    %2 = vector.load %arg2[%c0_1, %c0_2] : memref<16x256xbf16, #tpu.memory_space<vmem>>, vector<16x256xbf16>
    %cst = arith.constant dense<0.000000e+00> : vector<8x256xf32>
    %3 = tpu.matmul %1, %2, %cst {dimension_numbers = #tpu.dot_dimension_numbers<[1], [0], [0], [1], [0, 0, 1, 1], [], []>} : vector<8x16xbf16>, vector<16x256xbf16>, vector<8x256xf32> -> vector<8x256xf32>
    %c0_3 = arith.constant 0 : index
    %c0_4 = arith.constant 0 : index
    %4 = vector.load %arg3[%c0_3, %c0_4] : memref<1x256xf32, #tpu.memory_space<vmem>>, vector<1x256xf32>
    %5 = vector.broadcast %4 : vector<1x256xf32> to vector<8x256xf32>
    %6 = arith.addf %3, %5 : vector<8x256xf32>
    %cst_5 = arith.constant 0.000000e+00 : f32
    %7 = vector.broadcast %cst_5 : f32 to vector<8x256xf32>
    %8 = arith.maximumf %6, %7 : vector<8x256xf32>
    %9 = arith.truncf %8 : vector<8x256xf32> to vector<8x256xbf16>
    %c0_6 = arith.constant 0 : index
    %c0_7 = arith.constant 0 : index
    %10 = vector.load %arg4[%c0_6, %c0_7] : memref<256x512xbf16, #tpu.memory_space<vmem>>, vector<256x512xbf16>
    %cst_8 = arith.constant dense<0.000000e+00> : vector<8x512xf32>
    %11 = tpu.matmul %9, %10, %cst_8 {dimension_numbers = #tpu.dot_dimension_numbers<[1], [0], [0], [1], [0, 0, 1, 1], [], []>} : vector<8x256xbf16>, vector<256x512xbf16>, vector<8x512xf32> -> vector<8x512xf32>
    %c0_9 = arith.constant 0 : index
    %c0_10 = arith.constant 0 : index
    %12 = vector.load %arg5[%c0_9, %c0_10] : memref<1x512xf32, #tpu.memory_space<vmem>>, vector<1x512xf32>
    %13 = vector.broadcast %12 : vector<1x512xf32> to vector<8x512xf32>
    %14 = arith.addf %11, %13 : vector<8x512xf32>
    %cst_11 = arith.constant 0.000000e+00 : f32
    %15 = vector.broadcast %cst_11 : f32 to vector<8x512xf32>
    %16 = arith.maximumf %14, %15 : vector<8x512xf32>
    %17 = arith.truncf %16 : vector<8x512xf32> to vector<8x512xbf16>
    %c0_12 = arith.constant 0 : index
    %c0_13 = arith.constant 0 : index
    %18 = vector.load %arg6[%c0_12, %c0_13] : memref<512x128xbf16, #tpu.memory_space<vmem>>, vector<512x128xbf16>
    %cst_14 = arith.constant dense<0.000000e+00> : vector<8x128xf32>
    %19 = tpu.matmul %17, %18, %cst_14 {dimension_numbers = #tpu.dot_dimension_numbers<[1], [0], [0], [1], [0, 0, 1, 1], [], []>} : vector<8x512xbf16>, vector<512x128xbf16>, vector<8x128xf32> -> vector<8x128xf32>
    %c0_15 = arith.constant 0 : index
    %c0_16 = arith.constant 0 : index
    %20 = vector.load %arg7[%c0_15, %c0_16] : memref<8x128xf32, #tpu.memory_space<vmem>>, vector<8x128xf32>
    tpu.vector_store %arg7[%c0_15, %c0_16], %19 {strides = array<i32>} : memref<8x128xf32, #tpu.memory_space<vmem>>, vector<8x128xf32>,
    return
  }
  func.func @transform_0(%arg0: i32) -> (i32, i32) {
    %c0_i32 = arith.constant 0 : i32
    %c0_i32_0 = arith.constant 0 : i32
    return %arg0, %c0_i32 : i32, i32
  }
  func.func @transform_1(%arg0: i32) -> (i32, i32) {
    %c0_i32 = arith.constant 0 : i32
    %c0_i32_0 = arith.constant 0 : i32
    %c0_i32_1 = arith.constant 0 : i32
    return %c0_i32, %c0_i32_0 : i32, i32
  }
  func.func @transform_2(%arg0: i32) -> (i32, i32) {
    %c0_i32 = arith.constant 0 : i32
    %c0_i32_0 = arith.constant 0 : i32
    %c0_i32_1 = arith.constant 0 : i32
    return %c0_i32, %c0_i32_0 : i32, i32
  }
  func.func @transform_3(%arg0: i32) -> (i32, i32) {
    %c0_i32 = arith.constant 0 : i32
    %c0_i32_0 = arith.constant 0 : i32
    %c0_i32_1 = arith.constant 0 : i32
    return %c0_i32, %c0_i32_0 : i32, i32
  }
  func.func @transform_4(%arg0: i32) -> (i32, i32) {
    %c0_i32 = arith.constant 0 : i32
    %c0_i32_0 = arith.constant 0 : i32
    %c0_i32_1 = arith.constant 0 : i32
    return %c0_i32, %c0_i32_0 : i32, i32
  }
  func.func @transform_5(%arg0: i32) -> (i32, i32) {
    %c0_i32 = arith.constant 0 : i32
    %c0_i32_0 = arith.constant 0 : i32
    %c0_i32_1 = arith.constant 0 : i32
    return %c0_i32, %c0_i32_0 : i32, i32
  }
  func.func @transform_6(%arg0: i32) -> (i32, i32) {
    %c0_i32 = arith.constant 0 : i32
    %c0_i32_0 = arith.constant 0 : i32
    return %arg0, %c0_i32 : i32, i32
  }
}

</mosaic_0001>

<bundles_post_ra>
// kernel: tpu_custom_call.1
= control target key start
LH: loop header
LB: loop body
LE: loop exit
PB: predicated region body
PF: predicated region fallthrough
CT: control target
= control target key end

     0   :  { %11 = vsyncpa [#allocation3], 0  ;;  %s2221_s0 = inlined_call_operand.hbm [shape: f32[16,16], index: 0, kind: input, shape index: {}]   ;;  %s2222_s1 = inlined_call_operand.hbm [shape: bf16[16,256], index: 1, kind: input, shape index: {}]   ;;  %s2223_s2 = inlined_call_operand.vmem [shape: f32[1,256], index: 2, kind: input, shape index: {}]   ;;  %s2224_s3 = inlined_call_operand.hbm [shape: bf16[256,512], index: 3, kind: input, shape index: {}]   ;;  %s2225_s4 = inlined_call_operand.vmem [shape: f32[1,512], index: 4, kind: input, shape index: {}]   ;;  %s2226_s5 = inlined_call_operand.hbm [shape: bf16[512,128], index: 5, kind: input, shape index: {}]   ;;  %s2227_s6 = inlined_call_operand.hbm [shape: f32[16,128], index: 6, kind: output, shape index: {}]  }
   0x1   :  { %13 = vsyncpa [#allocation3 + $0x1], 0 }
   0x2   :  { %14 = vsyncpa [#allocation6], 0 }
   0x3   :  { %15 = vsyncpa [#allocation9], 0 }
   0x4   :  { %16 = vsyncpa [#allocation4], 0 }
   0x5   :  { %18 = vsyncpa [#allocation4 + $0x1], 0  ;;  %s1946_s21 = smov 0   ;;  %s1948_s22 = smov 0  }
   0x6   :  { %s1950_s23 = smov 0   ;;  %s1952_s24 = smov 0  }
   0x7 LB: > { %s1967_s25 = sadd.s32 4294967295, %s1897_s24   ;;  %s1333_s26 = sadd.s32 4294967294, %s1897_s24   ;;  %s1897_s24 = sphi %s1952_s24, %s2250_s24   ;;  %s1893_s23 = sphi %s1950_s23, %s2249_s23   ;;  %s1889_s22 = sphi %s1948_s22, %s2248_s22   ;;  %s1885_s21 = sphi %s1946_s21, %s2247_s21  }
   0x8   : > { %p44_p0 = scmp.ne.s32.totalorder %s1889_s22, %s1885_s21  ;;  %p2228_p1 = scmp.eq.s32.totalorder %s1967_s25, 0 }
   0x9   : > { %p179_p3 = scmp.eq.s32.totalorder %s1333_s26, 1  ;;  %p1334_p5 = scmp.ge.s32.totalorder %s1897_s24, 1 }
   0xa   : > { %p1976_p4 = por %p2228_p1, %p44_p0  ;;  %p186_p7 = scmp.lt.s32.totalorder %s1897_s24, 3 }
   0xb   : > { %p1981_p6 = por %p179_p3, %p44_p0  ;;  %s1899_s30 = smov [#allocation5]  }
   0xc   : > { %s2231_s27 = scalar_select %p1976_p4, 1, 0 }
   0xd   : > { %s2232_s28 = scalar_select %p1981_p6, 1, 0 }
   0xe   : > { %p1986_p8 = pnand %p1334_p5, %p186_p7  ;;  %s198_s7 = sshll.u32 %s1899_s30, 4  ;;  %s1990_s7 = int_to_ptr.vmem [resolvable:$true] %s198_s7 }
   0xf   : > { %s1900_s9 = smov [#allocation7]   ;;  %s1709_s13 = scalar_lea.hbm %s2222_s1, 256 }
  0x10   : > { %s2233_s29 = scalar_select %p1986_p8, 1, 0 }
  0x11   : > { %p1510_p9 = pneg %p1986_p8  ;;  %s214_s10 = sshll.u32 %s1900_s9, 4  ;;  %s2001_s10 = int_to_ptr.vmem [resolvable:$true] %s214_s10 }
  0x12   : > { %p1710_p12 = scmp.ne.s32.totalorder %s2222_s1, %s1709_s13  ;;  %p1716_p5 = scmp.lt.u32.totalorder %s1709_s13, %s2222_s1 }
  0x13   : > { %p1997_p11 = pnand %p1510_p9, %p2228_p1 }
  0x15   : > { %p2011_p13 = pneg %p1997_p11 }
  0x17   : > { %p1712_p0 = pnand %p2011_p13, %p1710_p12 }
  0x19   : > { %p1713_p3 = pneg %p1712_p0 }
  0x1b   : > { %p1718_p7 = pnand %p1716_p5, %p1713_p3 }
  0x1d   : > { %1721 = shalt.err (!%p1718_p7)
}
  0x1e   : > { %s1722_s19 = scalar_lea.vmem %s1990_s7, 256  ;;  %p1730_p2 = scmp.lt.s32.totalorder %s1990_s7, %s1990_s7 }
  0x1f   : > { %p1723_p9 = scmp.ne.s32.totalorder %s1990_s7, %s1722_s19  ;;  %p1731_p6 = scmp.lt.s32.totalorder %s1722_s19, %s1722_s19 }
  0x21   : > { %p1725_p10 = pnand %p1723_p9, %p2011_p13  ;;  %p1732_p12 = por %p1731_p6, %p1730_p2 }
  0x23   : > { %p1726_p1 = pneg %p1725_p10 }
  0x25   : > { %p1733_p0 = pnand %p1732_p12, %p1726_p1 }
  0x27   : > { %1736 = shalt.err (!%p1733_p0)
}
  0x28   : > { %s1901_s20 = smov 128   ;;  %s1902_s26 = smov 8  }
  0x29   : > { %1513 = dma.hbm_to_vmem [thread:$0]  (!%p1997_p11), %s2222_s1, 256, %s1990_s7, [#allocation6], %s1901_s20, %s1901_s20, %s1902_s26  }
  0x2a   : > { %s1737_s13 = scalar_lea.hbm %s2224_s3, 8192 }
  0x2b   : > { %p1738_p2 = scmp.ne.s32.totalorder %s2224_s3, %s1737_s13  ;;  %p1744_p10 = scmp.lt.u32.totalorder %s1737_s13, %s2224_s3 }
  0x2d   : > { %p1740_p1 = pnand %p1738_p2, %p2011_p13 }
  0x2f   : > { %p1741_p6 = pneg %p1740_p1 }
  0x31   : > { %p1746_p3 = pnand %p1744_p10, %p1741_p6 }
  0x33   : > { %1749 = shalt.err (!%p1746_p3)
}
  0x34   : > { %s1750_s7 = scalar_lea.vmem %s2001_s10, 8192  ;;  %p1758_p12 = scmp.lt.s32.totalorder %s2001_s10, %s2001_s10 }
  0x35   : > { %p1751_p5 = scmp.ne.s32.totalorder %s2001_s10, %s1750_s7  ;;  %p1759_p0 = scmp.lt.s32.totalorder %s1750_s7, %s1750_s7 }
  0x37   : > { %p1753_p7 = pnand %p1751_p5, %p2011_p13  ;;  %p1760_p2 = por %p1759_p0, %p1758_p12 }
  0x39   : > { %p1754_p9 = pneg %p1753_p7 }
  0x3b   : > { %p1761_p1 = pnand %p1760_p2, %p1754_p9 }
  0x3d   : > { %1764 = shalt.err (!%p1761_p1)
}
  0x3e   : > { %s1903_s19 = smov 256   ;;  %s1904_s20 = smov 16  }
  0x3f   : > { %1516 = dma.hbm_to_vmem [thread:$0]  (!%p1997_p11), %s2224_s3, 8192, %s2001_s10, [#allocation6], %s1903_s19, %s1903_s19, %s1904_s20  }
  0x40   : > { %s1905_s9 = smov [#allocation8]   ;;  %s1765_s14 = scalar_lea.hbm %s2226_s5, 4096 }
  0x41   : > { %s230_s11 = sshll.u32 %s1905_s9, 4  ;;  %p1766_p6 = scmp.ne.s32.totalorder %s2226_s5, %s1765_s14  ;;  %s231_s11 = int_to_ptr.vmem [resolvable:$true] %s230_s11 }
  0x42   : > { %p1772_p5 = scmp.lt.u32.totalorder %s1765_s14, %s2226_s5 }
  0x43   : > { %p1768_p10 = pnand %p1766_p6, %p2011_p13 }
  0x45   : > { %p1769_p3 = pneg %p1768_p10 }
  0x47   : > { %p1774_p7 = pnand %p1772_p5, %p1769_p3 }
  0x49   : > { %1777 = shalt.err (!%p1774_p7)
}
  0x4a   : > { %s1778_s10 = scalar_lea.vmem %s231_s11, 4096  ;;  %p1786_p2 = scmp.lt.s32.totalorder %s231_s11, %s231_s11 }
  0x4b   : > { %p1779_p9 = scmp.ne.s32.totalorder %s231_s11, %s1778_s10  ;;  %p1787_p1 = scmp.lt.s32.totalorder %s1778_s10, %s1778_s10 }
  0x4d   : > { %p1781_p12 = pnand %p1779_p9, %p2011_p13  ;;  %p1788_p4 = por %p1787_p1, %p1786_p2 }
  0x4f   : > { %p1782_p0 = pneg %p1781_p12 }
  0x51   : > { %p1789_p8 = pnand %p1788_p4, %p1782_p0 }
  0x53   : > { %1792 = shalt.err (!%p1789_p8)
}
  0x54   : > { %s1906_s19 = smov 64   ;;  %s1907_s16 = smov 4  }
  0x55   : > { %1519 = dma.hbm_to_vmem [thread:$0]  (!%p1997_p11), %s2226_s5, 4096, %s231_s11, [#allocation9], %s1906_s19, %s1906_s19, %s1907_s16  }
  0x56   : > { %s2074_s30 = sadd.s32 1, %s1897_s24   ;;  %s31_s12 = sadd.s32 1, %s1893_s23 }
  0x57   : > { %s28_s9 = ssub.s32 %s1897_s24, %s2074_s30  ;;  %p38_p8 = scmp.ne.s32.totalorder %s1893_s23, %s1889_s22 }
  0x58   : > { %p29_p4 = scmp.eq.s32.totalorder %s28_s9, 0  ;;  %p39_p13 = scmp.eq.s32.totalorder %s1897_s24, 0 }
  0x59   : > { %p1531_p6 = scmp.lt.s32.totalorder %s1897_s24, 2  ;;  %p2236_p3 = scmp.eq.s32.totalorder %s1967_s25, 1 }
  0x5a   : > { %s2084_s13 = scalar_select %p29_p4, %s1893_s23, %s31_s12  }
  0x5b   : > { %p40_p10 = por %p39_p13, %p38_p8  ;;  %p2088_p5 = por %p2236_p3, %p38_p8 }
  0x5c   : > { %s244_s8 = sand.u32 1, %s1893_s23   ;;  %s1340_s15 = sshll.u32 %s1897_s24, 7 }
  0x5d   : > { %s1339_s11 = sshll.u32 %s244_s8, 3  ;;  %s2097_s7 = scalar_lea.hbm %s2221_s0, %s1340_s15 }
  0x5e   : > { %s248_s10 = scalar_lea.vmem [#allocation2], %s1339_s11  ;;  %p2099_p11 = pnand %p1531_p6, %p40_p10 }
  0x5f   : > { %s255_s19 = sshll.u32 %s248_s10, 4  ;;  %s245_s20 = scalar_lea.sflag [#allocation3], %s244_s8  ;;  %s2103_s19 = int_to_ptr.vmem [resolvable:$true] %s255_s19 }
  0x60   : > { %s1793_s26 = scalar_lea.hbm %s2097_s7, 128  ;;  %p1795_p9 = pneg %p2099_p11 }
  0x61   : > { %p1794_p7 = scmp.ne.s32.totalorder %s2097_s7, %s1793_s26  ;;  %s1798_s15 = scalar_lea.hbm %s2221_s0, 256 }
  0x62   : > { %p1799_p2 = scmp.lt.u32.totalorder %s2097_s7, %s2221_s0  ;;  %p1800_p1 = scmp.lt.u32.totalorder %s1798_s15, %s1793_s26 }
  0x63   : > { %p1796_p12 = pnand %p1795_p9, %p1794_p7  ;;  %p1802_p8 = scmp.lt.u32.totalorder %s1793_s26, %s2097_s7 }
  0x64   : > { %p1801_p4 = por %p1800_p1, %p1799_p2 }
  0x65   : > { %p1797_p0 = pneg %p1796_p12 }
  0x66   : > { %p1803_p13 = por %p1802_p8, %p1801_p4 }
  0x68   : > { %p1804_p6 = pnand %p1803_p13, %p1797_p0 }
  0x6a   : > { %1807 = shalt.err (!%p1804_p6)
}
  0x6b   : > { %s1808_s8 = scalar_lea.vmem %s2103_s19, 128  ;;  %s1908_s18 = smov [#allocation2]  }
  0x6c   : > { %p1809_p10 = scmp.ne.s32.totalorder %s2103_s19, %s1808_s8  ;;  %s1813_s10 = sshll.u32 %s1908_s18, 4  ;;  %s1814_s10 = int_to_ptr.vmem [resolvable:$false] %s1813_s10 }
  0x6d   : > { %s1815_s9 = scalar_lea.vmem %s1814_s10, 256  ;;  %p1816_p12 = scmp.lt.s32.totalorder %s2103_s19, %s1814_s10 }
  0x6e   : > { %p1811_p3 = pnand %p1809_p10, %p1795_p9  ;;  %p1817_p2 = scmp.lt.s32.totalorder %s1815_s9, %s1808_s8 }
  0x70   : > { %p1812_p7 = pneg %p1811_p3  ;;  %p1818_p1 = por %p1817_p2, %p1816_p12 }
  0x72   : > { %p1819_p4 = pnand %p1818_p1, %p1812_p7 }
  0x74   : > { %1822 = shalt.err (!%p1819_p4)
}
  0x75   : > { %1523 = dma.hbm_to_vmem [thread:$0]  (!%p2099_p11), %s2097_s7, 128, %s2103_s19, %s245_s20  }
  0x76   : > { %p2239_p0 = scmp.ne.s32.totalorder %s2233_s29, 0 }
  0x77   : > { %s2133_s26 = sand.u32 (!%p2239_p0), 1, %s1889_s22   ;;  %p2240_p9 = scmp.ne.s32.totalorder (!%p2239_p0), %s2231_s27, 0 }
  0x78   : > { %264 = sbr.rel (%p2239_p0) target bundleno = 811 (0x32b), region = 44  ;;  %s1342_s12 = sshll.u32 (!%p2239_p0), %s2133_s26, 3 }
  0x79   : > { %s267_s15 = scalar_lea.sflag (!%p2239_p0), [#allocation3], %s2133_s26  ;;  %s270_s11 = scalar_lea.vmem (!%p2239_p0), [#allocation2], %s1342_s12 }
  0x7f   : > { %1868 = dma.done.wait (%p2240_p9), %s267_s15, 128  }
  0x80   : > { %1870 = vsyncadd (%p2240_p9), %s267_s15, 4294967168  ;;  %p2241_p11 = scmp.eq.s32.totalorder %s1967_s25, 0 }
  0x82   : > { %1872 = dma.done.wait (%p2241_p11), [#allocation6], 8448   ;;  %p2242_p8 = pmov %p2241_p11 }
  0x84   : > { %1874 = vsyncadd (%p2242_p8), [#allocation6], 4294958848  ;;  %p2243_p13 = pmov %p2242_p8 }
  0x85   : > { %p2244_p6 = pmov %p2242_p8 }
  0x86   : > { %1876 = dma.done.wait (%p2243_p13), [#allocation9], 4096  }
  0x87   : > { %1878 = vsyncadd (%p2244_p6), [#allocation9], 4294963200  ;;  %v1909_v0 = vmov 0   ;;  %v1578_v1 = vld [vmem:[#allocation5 + $0x4] ss:$8 sps:$4 sm:$0xff]   ;;  %v312_v3 = vld [vmem:[%s270_s11] sm:$0xff] }
  0x88   : > { %374 = vmatprep.mubr.bf16.mxu0 %v1909_v0  ;;  %v1580_v2 = vld [vmem:[#allocation5] ss:$8 sps:$4 sm:$0xff]   ;;  %342 = vmatprep.subr.bf16.mxu0 %v1578_v1  ;;  %v313_v4 = vpack.c.bf16 %v312_v3, %v312_v3  ;;  %v1581_v5 = vld [vmem:[#allocation7 + $0x4] ss:$16 sps:$4 sm:$0xff]   ;;  %vm338_vm0 = vcmask 130048   ;;  %s1447_s16 = sshll.u32 %s1967_s25, 7 }
  0x89   : > { %343 = vmatpush1.bf16.msra.mxu0 %v1580_v2  ;;  %v1583_v6 = vld [vmem:[#allocation7 + $0x8] ss:$16 sps:$4 sm:$0xff]   ;;  %v1585_v7 = vld [vmem:[#allocation7 + $0xc] ss:$16 sps:$4 sm:$0xff]   ;;  %793 = vmatprep.subr.bf16.mxu1 %v1581_v5  ;;  %v1586_v8 = vld [vmem:[#allocation7] ss:$16 sps:$4 sm:$0xff]   ;;  %s2177_s10 = scalar_lea.hbm %s2227_s6, %s1447_s16 }
  0x8a   : > { %834 = vmatprep.subr.bf16.mxu0 %v1585_v7  ;;  %v1587_v9 = vld [vmem:[#allocation7 + $0x24] ss:$16 sps:$4 sm:$0xff]   ;;  %794 = vmatpush1.bf16.msra.mxu1 %v1586_v8  ;;  %v1589_v10 = vld [vmem:[#allocation7 + $0x28] ss:$16 sps:$4 sm:$0xff]   ;;  %v1591_v11 = vld [vmem:[#allocation7 + $0x2c] ss:$16 sps:$4 sm:$0xff]   ;;  %v318_v7 = vlaneseq }
  0x8b   : > { %v1592_v12 = vld [vmem:[#allocation7 + $0x20] ss:$16 sps:$4 sm:$0xff]   ;;  %795 = vmatprep.subr.bf16.mxu1 %v1587_v9  ;;  %v1593_v13 = vld [vmem:[#allocation7 + $0x44] ss:$16 sps:$4 sm:$0xff]   ;;  %v1597_v14 = vld [vmem:[#allocation7 + $0x4c] ss:$16 sps:$4 sm:$0xff]  }
  0x8c   : > { %1349 = vmatmul.mubr.msk.bf16.vlgmr.msra.gmra.mrb[0].mxu0 %vm338_vm0, %v313_v4  ;;  %v1598_v15 = vld [vmem:[#allocation7 + $0x40] ss:$16 sps:$4 sm:$0xff]   ;;  %v1595_v16 = vld [vmem:[#allocation7 + $0x48] ss:$16 sps:$4 sm:$0xff]   ;;  %v1599_v17 = vld [vmem:[#allocation7 + $0x64] ss:$16 sps:$4 sm:$0xff]  }
  0x8d   : > { %835 = vmatpush1.bf16.msra.mxu0 %v1583_v6  ;;  %v1603_v18 = vld [vmem:[#allocation7 + $0x6c] ss:$16 sps:$4 sm:$0xff]   ;;  %v1601_v19 = vld [vmem:[#allocation7 + $0x68] ss:$16 sps:$4 sm:$0xff]   ;;  %v1604_v20 = vld [vmem:[#allocation7 + $0x60] ss:$16 sps:$4 sm:$0xff]  }
  0x8e   : > { %836 = vmatprep.subr.bf16.mxu0 %v1591_v11  ;;  %796 = vmatpush1.bf16.msra.mxu1 %v1592_v12  ;;  %v1605_v21 = vld [vmem:[#allocation7 + $0x84] ss:$16 sps:$4 sm:$0xff]   ;;  %v1609_v22 = vld [vmem:[#allocation7 + $0x8c] ss:$16 sps:$4 sm:$0xff]   ;;  %v1610_v23 = vld [vmem:[#allocation7 + $0x80] ss:$16 sps:$4 sm:$0xff]  }
  0x8f   : > { %797 = vmatprep.subr.bf16.mxu1 %v1593_v13  ;;  %v1607_v24 = vld [vmem:[#allocation7 + $0x88] ss:$16 sps:$4 sm:$0xff]   ;;  %v1611_v25 = vld [vmem:[#allocation7 + $0xa4] ss:$16 sps:$4 sm:$0xff]   ;;  %v1615_v26 = vld [vmem:[#allocation7 + $0xac] ss:$16 sps:$4 sm:$0xff]  }
  0x90   : > { %v1613_v27 = vld [vmem:[#allocation7 + $0xa8] ss:$16 sps:$4 sm:$0xff]   ;;  %v1616_v28 = vld [vmem:[#allocation7 + $0xa0] ss:$16 sps:$4 sm:$0xff]   ;;  %v1617_v29 = vld [vmem:[#allocation7 + $0xc4] ss:$16 sps:$4 sm:$0xff]  }
  0x91   : > { %837 = vmatpush1.bf16.msra.mxu0 %v1589_v10  ;;  %v1621_v30 = vld [vmem:[#allocation7 + $0xcc] ss:$16 sps:$4 sm:$0xff]   ;;  %v1622_v31 = vld [vmem:[#allocation7 + $0xc0] ss:$16 sps:$4 sm:$0xff]   ;;  %v1619_v32 = vld [vmem:[#allocation7 + $0xc8] ss:$16 sps:$4 sm:$0xff]  }
  0x92   : > { %838 = vmatprep.subr.bf16.mxu0 %v1597_v14  ;;  %798 = vmatpush1.bf16.msra.mxu1 %v1598_v15  ;;  %v1623_v33 = vld [vmem:[#allocation7 + $0xe4] ss:$16 sps:$4 sm:$0xff]   ;;  %v1627_v34 = vld [vmem:[#allocation7 + $0xec] ss:$16 sps:$4 sm:$0xff]   ;;  %v1625_v35 = vld [vmem:[#allocation7 + $0xe8] ss:$16 sps:$4 sm:$0xff]  }
  0x93   : > { %799 = vmatprep.subr.bf16.mxu1 %v1599_v17  ;;  %v1628_v36 = vld [vmem:[#allocation7 + $0xe0] ss:$16 sps:$4 sm:$0xff]   ;;  %v1629_v37 = vld [vmem:[#allocation7 + $0x104] ss:$16 sps:$4 sm:$0xff]   ;;  %v1633_v38 = vld [vmem:[#allocation7 + $0x10c] ss:$16 sps:$4 sm:$0xff]  }
  0x94   : > { %v1634_v39 = vld [vmem:[#allocation7 + $0x100] ss:$16 sps:$4 sm:$0xff]   ;;  %v1631_v40 = vld [vmem:[#allocation7 + $0x108] ss:$16 sps:$4 sm:$0xff]   ;;  %v1635_v41 = vld [vmem:[#allocation7 + $0x124] ss:$16 sps:$4 sm:$0xff]  }
  0x95   : > { %839 = vmatpush1.bf16.msra.mxu0 %v1595_v16  ;;  %v1639_v42 = vld [vmem:[#allocation7 + $0x12c] ss:$16 sps:$4 sm:$0xff]   ;;  %v1637_v43 = vld [vmem:[#allocation7 + $0x128] ss:$16 sps:$4 sm:$0xff]   ;;  %v1640_v44 = vld [vmem:[#allocation7 + $0x120] ss:$16 sps:$4 sm:$0xff]  }
  0x96   : > { %840 = vmatprep.subr.bf16.mxu0 %v1603_v18  ;;  %800 = vmatpush1.bf16.msra.mxu1 %v1604_v20  ;;  %v1641_v45 = vld [vmem:[#allocation7 + $0x144] ss:$16 sps:$4 sm:$0xff]   ;;  %v1645_v46 = vld [vmem:[#allocation7 + $0x14c] ss:$16 sps:$4 sm:$0xff]   ;;  %v1646_v47 = vld [vmem:[#allocation7 + $0x140] ss:$16 sps:$4 sm:$0xff]  }
  0x97   : > { %801 = vmatprep.subr.bf16.mxu1 %v1605_v21  ;;  %v1643_v48 = vld [vmem:[#allocation7 + $0x148] ss:$16 sps:$4 sm:$0xff]   ;;  %v1647_v49 = vld [vmem:[#allocation7 + $0x164] ss:$16 sps:$4 sm:$0xff]   ;;  %v1651_v50 = vld [vmem:[#allocation7 + $0x16c] ss:$16 sps:$4 sm:$0xff]  }
  0x98   : > { %v1652_v51 = vld [vmem:[#allocation7 + $0x160] ss:$16 sps:$4 sm:$0xff]   ;;  %v1649_v52 = vld [vmem:[#allocation7 + $0x168] ss:$16 sps:$4 sm:$0xff]   ;;  %v1653_v53 = vld [vmem:[#allocation7 + $0x184] ss:$16 sps:$4 sm:$0xff]  }
  0x99   : > { %841 = vmatpush1.bf16.msra.mxu0 %v1601_v19  ;;  %v1657_v54 = vld [vmem:[#allocation7 + $0x18c] ss:$16 sps:$4 sm:$0xff]   ;;  %v1658_v55 = vld [vmem:[#allocation7 + $0x180] ss:$16 sps:$4 sm:$0xff]   ;;  %v1655_v56 = vld [vmem:[#allocation7 + $0x188] ss:$16 sps:$4 sm:$0xff]  }
  0x9a   : > { %842 = vmatprep.subr.bf16.mxu0 %v1609_v22  ;;  %802 = vmatpush1.bf16.msra.mxu1 %v1610_v23  ;;  %v1659_v57 = vld [vmem:[#allocation7 + $0x1a4] ss:$16 sps:$4 sm:$0xff]   ;;  %v1663_v58 = vld [vmem:[#allocation7 + $0x1ac] ss:$16 sps:$4 sm:$0xff]   ;;  %v1664_v59 = vld [vmem:[#allocation7 + $0x1a0] ss:$16 sps:$4 sm:$0xff]  }
  0x9b   : > { %803 = vmatprep.subr.bf16.mxu1 %v1611_v25  ;;  %v1661_v60 = vld [vmem:[#allocation7 + $0x1a8] ss:$16 sps:$4 sm:$0xff]   ;;  %v1665_v61 = vld [vmem:[#allocation7 + $0x1c4] ss:$16 sps:$4 sm:$0xff]   ;;  %v1669_v62 = vld [vmem:[#allocation7 + $0x1cc] ss:$16 sps:$4 sm:$0xff]  }
  0x9c   : > { %v1667_v63 = vld [vmem:[#allocation7 + $0x1c8] ss:$16 sps:$4 sm:$0xff]   ;;  %v1670_v0 = vld [vmem:[#allocation7 + $0x1c0] ss:$16 sps:$4 sm:$0xff]   ;;  %v1671_v1 = vld [vmem:[#allocation7 + $0x1e4] ss:$16 sps:$4 sm:$0xff]  }
  0x9d   : > { %843 = vmatpush1.bf16.msra.mxu0 %v1607_v24  ;;  %v1675_v2 = vld [vmem:[#allocation7 + $0x1ec] ss:$16 sps:$4 sm:$0xff]   ;;  %v1673_v3 = vld [vmem:[#allocation7 + $0x1e8] ss:$16 sps:$4 sm:$0xff]   ;;  %v1676_v4 = vld [vmem:[#allocation7 + $0x1e0] ss:$16 sps:$4 sm:$0xff]  }
  0x9e   : > { %844 = vmatprep.subr.bf16.mxu0 %v1615_v26  ;;  %804 = vmatpush1.bf16.msra.mxu1 %v1616_v28  ;;  %v1677_v5 = vld [vmem:[#allocation8 + $0x40] sm:$0xff]   ;;  %v2151_v8 = vshrl.u32 %v318_v7, 7  ;;  %v1681_v26 = vld [vmem:[#allocation8 + $0x48] sm:$0xff]   ;;  %s310_s20 = scalar_lea.vmem [#allocation10], %s1342_s12  ;;  %s1221_s25 = scalar_lea.sflag [#allocation4], %s2133_s26 }
  0x9f   : > { %805 = vmatprep.subr.bf16.mxu1 %v1617_v29  ;;  %v1678_v6 = vld [vmem:[#allocation8 + $0xc0] sm:$0xff]   ;;  %v1683_v28 = vld [vmem:[#allocation8 + $0x8] sm:$0xff]   ;;  %s1234_s17 = sshll.u32 %s310_s20, 4  ;;  %s1910_s12 = smov [#allocation10]   ;;  %s2179_s17 = int_to_ptr.vmem [resolvable:$true] %s1234_s17 }
  0xa0   : > { %v320_v9 = vsub.s32 0, %v2151_v8  ;;  %v316_v10 = vld [vmem:[%s2223_s2] sm:$0x3]  ;;  %v324_v11 = vsub.s32 1, %v2151_v8  ;;  %v1684_v29 = vld [vmem:[#allocation8 + $0x88] sm:$0xff]   ;;  %s1823_s9 = scalar_lea.vmem %s2179_s17, 128 }
  0xa1   : > { %845 = vmatpush1.bf16.msra.mxu0 %v1613_v27  ;;  %v1679_v23 = vld [vmem:[#allocation8] sm:$0xff]   ;;  %v1682_v27 = vld [vmem:[#allocation8 + $0xc8] sm:$0xff]   ;;  %p1824_p10 = scmp.ne.s32.totalorder %s2179_s17, %s1823_s9  ;;  %s1827_s15 = sshll.u32 %s1910_s12, 4  ;;  %s1828_s15 = int_to_ptr.vmem [resolvable:$false] %s1827_s15 }
  0xa2   : > { %846 = vmatprep.subr.bf16.mxu0 %v1621_v30  ;;  %806 = vmatpush1.bf16.msra.mxu1 %v1622_v31  ;;  %v321_v12 = vrot.slane %v316_v10, %v320_v9  ;;  %v325_v13 = vrot.slane %v316_v10, %v324_v11  ;;  %v1680_v24 = vld [vmem:[#allocation8 + $0x80] sm:$0xff]   ;;  %v1685_v30 = vld [vmem:[#allocation8 + $0x50] sm:$0xff]   ;;  %s1829_s11 = scalar_lea.vmem %s1828_s15, 256  ;;  %p1830_p12 = scmp.lt.s32.totalorder %s2179_s17, %s1828_s15 }
  0xa3   : > { %807 = vmatprep.subr.bf16.mxu1 %v1623_v33  ;;  %v1686_v31 = vld [vmem:[#allocation8 + $0xd0] sm:$0xff]   ;;  %p1825_p3 = pnand %p1824_p10, %p2088_p5  ;;  %p1831_p2 = scmp.lt.s32.totalorder %s1829_s11, %s1823_s9 }
  0xa4   : > { %v1688_v33 = vld [vmem:[#allocation8 + $0x90] sm:$0xff]  }
  0xa5   : > { %847 = vmatpush1.bf16.msra.mxu0 %v1619_v32  ;;  %v1687_v32 = vld [vmem:[#allocation8 + $0x10] sm:$0xff]   ;;  %p1826_p7 = pneg %p1825_p3  ;;  %p1832_p1 = por %p1831_p2, %p1830_p12 }
  0xa6   : > { %848 = vmatprep.subr.bf16.mxu0 %v1627_v34  ;;  %808 = vmatpush1.bf16.msra.mxu1 %v1628_v36  ;;  %v1689_v34 = vld [vmem:[#allocation8 + $0x58] sm:$0xff]  }
  0xa7   : > { %809 = vmatprep.subr.bf16.mxu1 %v1629_v37  ;;  %v1691_v36 = vld [vmem:[#allocation8 + $0x18] sm:$0xff]   ;;  %p1833_p4 = pnand %p1832_p1, %p1826_p7 }
  0xa8   : > { %v1692_v37 = vld [vmem:[#allocation8 + $0x98] sm:$0xff]  }
  0xa9   : > { %849 = vmatpush1.bf16.msra.mxu0 %v1625_v35  ;;  %v1690_v35 = vld [vmem:[#allocation8 + $0xd8] sm:$0xff]  }
  0xaa   : > { %850 = vmatprep.subr.bf16.mxu0 %v1633_v38  ;;  %810 = vmatpush1.bf16.msra.mxu1 %v1634_v39  ;;  %v1693_v38 = vld [vmem:[#allocation8 + $0x60] sm:$0xff]  }
  0xab   : > { %811 = vmatprep.subr.bf16.mxu1 %v1635_v41  ;;  %v1694_v39 = vld [vmem:[#allocation8 + $0xe0] sm:$0xff]  }
  0xac   : > { %v1696_v41 = vld [vmem:[#allocation8 + $0xa0] sm:$0xff]  }
  0xad   : > { %851 = vmatpush1.bf16.msra.mxu0 %v1631_v40  ;;  %v1695_v40 = vld [vmem:[#allocation8 + $0x20] sm:$0xff]  }
  0xae   : > { %852 = vmatprep.subr.bf16.mxu0 %v1639_v42  ;;  %812 = vmatpush1.bf16.msra.mxu1 %v1640_v44  ;;  %v1697_v42 = vld [vmem:[#allocation8 + $0x68] sm:$0xff]  }
  0xaf   : > { %813 = vmatprep.subr.bf16.mxu1 %v1641_v45  ;;  %v1699_v44 = vld [vmem:[#allocation8 + $0x28] sm:$0xff]  }
  0xb0   : > { %v1700_v45 = vld [vmem:[#allocation8 + $0xa8] sm:$0xff]  }
  0xb1   : > { %853 = vmatpush1.bf16.msra.mxu0 %v1637_v43  ;;  %v1698_v43 = vld [vmem:[#allocation8 + $0xe8] sm:$0xff]  }
  0xb2   : > { %854 = vmatprep.subr.bf16.mxu0 %v1645_v46  ;;  %814 = vmatpush1.bf16.msra.mxu1 %v1646_v47  ;;  %v1701_v46 = vld [vmem:[#allocation8 + $0x70] sm:$0xff]  }
  0xb3   : > { %815 = vmatprep.subr.bf16.mxu1 %v1647_v49  ;;  %v1702_v47 = vld [vmem:[#allocation8 + $0xf0] sm:$0xff]  }
  0xb4   : > { %v1704_v49 = vld [vmem:[#allocation8 + $0xb0] sm:$0xff]  }
  0xb5   : > { %855 = vmatpush1.bf16.msra.mxu0 %v1643_v48  ;;  %v1703_v48 = vld [vmem:[#allocation8 + $0x30] sm:$0xff]  }
  0xb6   : > { %856 = vmatprep.subr.bf16.mxu0 %v1651_v50  ;;  %816 = vmatpush1.bf16.msra.mxu1 %v1652_v51  ;;  %v1705_v50 = vld [vmem:[#allocation8 + $0x78] sm:$0xff]  }
  0xb7   : > { %817 = vmatprep.subr.bf16.mxu1 %v1653_v53  ;;  %v1706_v51 = vld [vmem:[#allocation8 + $0xf8] sm:$0xff]  }
  0xb8   : > { %v1708_v53 = vld [vmem:[#allocation8 + $0xb8] sm:$0xff]  }
  0xb9   : > { %857 = vmatpush1.bf16.msra.mxu0 %v1649_v52  ;;  %v1707_v52 = vld [vmem:[#allocation8 + $0x38] sm:$0xff]  }
  0xba   : > { %858 = vmatprep.subr.bf16.mxu0 %v1657_v54  ;;  %818 = vmatpush1.bf16.msra.mxu1 %v1658_v55  ;;  %v463_v54 = vsub.s32 2, %v2151_v8  ;;  %v451_v55 = vld [vmem:[%s2225_s4] sm:$0xf] }
  0xbb   : > { %819 = vmatprep.subr.bf16.mxu1 %v1659_v57  ;;  %v456_v57 = vrot.slane %v451_v55, %v320_v9 }
  0xbd   : > { %859 = vmatpush1.bf16.msra.mxu0 %v1655_v56  ;;  %v467_v56 = vsub.s32 3, %v2151_v8 }
  0xbe   : > { %860 = vmatprep.subr.bf16.mxu0 %v1663_v58  ;;  %820 = vmatpush1.bf16.msra.mxu1 %v1664_v59  ;;  %v464_v58 = vrot.slane %v451_v55, %v463_v54  ;;  %v460_v59 = vrot.slane %v451_v55, %v324_v11 }
  0xbf   : > { %821 = vmatprep.subr.bf16.mxu1 %v1665_v61 }
  0xc1   : > { %861 = vmatpush1.bf16.msra.mxu0 %v1661_v60  ;;  %v468_v60 = vrot.slane %v451_v55, %v467_v56 }
  0xc2   : > { %862 = vmatprep.subr.bf16.mxu0 %v1669_v62  ;;  %822 = vmatpush1.bf16.msra.mxu1 %v1670_v0 }
  0xc3   : > { %823 = vmatprep.subr.bf16.mxu1 %v1671_v1 }
  0xc5   : > { %863 = vmatpush1.bf16.msra.mxu0 %v1667_v63 }
  0xc6   : > { %864 = vmatprep.subr.bf16.mxu0 %v1675_v2  ;;  %824 = vmatpush1.bf16.msra.mxu1 %v1676_v4 }
  0xc7   : > { %1450 = vmatprep.subr.bf16.mxu1 %v1677_v5 }
  0xc9   : > { %865 = vmatpush1.bf16.msra.mxu0 %v1673_v3 }
  0xca   : > { %1472 = vmatprep.subr.bf16.mxu0 %v1678_v6 }
 0x15f   : > { %v376_v14 = vpop.f32.mrb[0].mxu0 }
 0x160   : > { %v377_v15 = vadd.f32 %v376_v14, %v321_v12  ;;  %v378_v16 = vpop.f32.mrb[1].mxu0 }
 0x161   : > { %v379_v17 = vadd.f32 %v378_v16, %v325_v13  ;;  %v380_v18 = vpop.f32.mrb[2].mxu0 }
 0x162   : > { %v383_v19 = vmax.f32 %v377_v15, 0.0  ;;  %v381_v20 = vpop.f32.mrb[3].mxu0 }
 0x163   : > { %v384_v21 = vmax.f32 %v379_v17, 0.0 }
 0x164   : > { %v385_v25 = vpack.c.bf16 %v383_v19, %v383_v19 }
 0x165   : > { %v386_v22 = vpack.c.bf16 %v384_v21, %v384_v21 }
 0x167   : > { %825 = vmatprep.mubr.bf16.mxu1 %v386_v22  ;;  %866 = vmatprep.mubr.bf16.mxu0 %v386_v22 }
 0x168   : > { %826 = vmatmul.mubr.bf16.vlgmr.msra.gmra.mrb[0].mxu1 %v385_v25  ;;  %867 = vmatmul.mubr.bf16.vlgmr.msra.gmra.mrb[4].mxu0 %v385_v25 }
 0x169   : > { %1451 = vmatpush3.bf16.msra.mxu1 %v1679_v23  ;;  %1473 = vmatpush3.bf16.msra.mxu0 %v1680_v24 }
 0x16a   : > { %1452 = vmatprep.subr.bf16.mxu1 %v1681_v26  ;;  %1474 = vmatprep.subr.bf16.mxu0 %v1682_v27 }
 0x16d   : > { %1453 = vmatpush3.bf16.msra.mxu1 %v1683_v28  ;;  %1475 = vmatpush3.bf16.msra.mxu0 %v1684_v29 }
 0x16e   : > { %1454 = vmatprep.subr.bf16.mxu1 %v1685_v30  ;;  %1476 = vmatprep.subr.bf16.mxu0 %v1686_v31 }
 0x171   : > { %1455 = vmatpush3.bf16.msra.mxu1 %v1687_v32  ;;  %1477 = vmatpush3.bf16.msra.mxu0 %v1688_v33 }
 0x172   : > { %1456 = vmatprep.subr.bf16.mxu1 %v1689_v34  ;;  %1478 = vmatprep.subr.bf16.mxu0 %v1690_v35 }
 0x175   : > { %1457 = vmatpush3.bf16.msra.mxu1 %v1691_v36  ;;  %1479 = vmatpush3.bf16.msra.mxu0 %v1692_v37 }
 0x176   : > { %1458 = vmatprep.subr.bf16.mxu1 %v1693_v38  ;;  %1480 = vmatprep.subr.bf16.mxu0 %v1694_v39 }
 0x179   : > { %1459 = vmatpush3.bf16.msra.mxu1 %v1695_v40  ;;  %1481 = vmatpush3.bf16.msra.mxu0 %v1696_v41 }
 0x17a   : > { %1460 = vmatprep.subr.bf16.mxu1 %v1697_v42  ;;  %1482 = vmatprep.subr.bf16.mxu0 %v1698_v43 }
 0x17d   : > { %1461 = vmatpush3.bf16.msra.mxu1 %v1699_v44  ;;  %1483 = vmatpush3.bf16.msra.mxu0 %v1700_v45 }
 0x17e   : > { %1462 = vmatprep.subr.bf16.mxu1 %v1701_v46  ;;  %1484 = vmatprep.subr.bf16.mxu0 %v1702_v47 }
 0x181   : > { %1463 = vmatpush3.bf16.msra.mxu1 %v1703_v48  ;;  %1485 = vmatpush3.bf16.msra.mxu0 %v1704_v49 }
 0x182   : > { %1464 = vmatprep.subr.bf16.mxu1 %v1705_v50  ;;  %1486 = vmatprep.subr.bf16.mxu0 %v1706_v51 }
 0x185   : > { %1465 = vmatpush3.bf16.msra.mxu1 %v1707_v52  ;;  %1487 = vmatpush3.bf16.msra.mxu0 %v1708_v53 }
 0x23b   : > { %v827_v61 = vpop.f32.mrb[0].mxu1  ;;  %v868_v62 = vpop.f32.mrb[4].mxu0 }
 0x23c   : > { %v828_v63 = vadd.f32 %v827_v61, %v456_v57  ;;  %v869_v0 = vadd.f32 %v868_v62, %v464_v58  ;;  %v829_v1 = vpop.f32.mrb[1].mxu1  ;;  %v870_v2 = vpop.f32.mrb[5].mxu0 }
 0x23d   : > { %v830_v3 = vadd.f32 %v829_v1, %v460_v59  ;;  %v871_v4 = vadd.f32 %v870_v2, %v468_v60  ;;  %v831_v5 = vpop.f32.mrb[2].mxu1  ;;  %v872_v6 = vpop.f32.mrb[6].mxu0 }
 0x23e   : > { %v875_v7 = vmax.f32 %v828_v63, 0.0  ;;  %v877_v10 = vmax.f32 %v869_v0, 0.0  ;;  %v832_v12 = vpop.f32.mrb[3].mxu1  ;;  %v873_v9 = vpop.f32.mrb[7].mxu0 }
 0x23f   : > { %v876_v13 = vmax.f32 %v830_v3, 0.0  ;;  %v878_v8 = vmax.f32 %v871_v4, 0.0 }
 0x240   : > { %v879_v15 = vpack.c.bf16 %v875_v7, %v875_v7  ;;  %v881_v16 = vpack.c.bf16 %v877_v10, %v877_v10 }
 0x241   : > { %v880_v11 = vpack.c.bf16 %v876_v13, %v876_v13  ;;  %v882_v14 = vpack.c.bf16 %v878_v8, %v878_v8 }
 0x243   : > { %1171 = vmatprep.mubr.bf16.mxu1 %v880_v11  ;;  %1211 = vmatprep.mubr.bf16.mxu0 %v882_v14 }
 0x244   : > { %1172 = vmatmul.mubr.bf16.vlgmr.msra.gmra.mrb[4].mxu1 %v879_v15  ;;  %1212 = vmatmul.mubr.bf16.vlgmr.msra.gmra.mrb[8].mxu0 %v881_v16 }
 0x317   : > { %v1466_v17 = vpop.f32.mrb[4].mxu1  ;;  %v1488_v18 = vpop.f32.mrb[8].mxu0 }
 0x318   : > { %v1467_v19 = vpop.f32.mrb[5].mxu1  ;;  %v1489_v20 = vpop.f32.mrb[9].mxu0 }
 0x319   : > { %v1468_v21 = vadd.f32 %v1467_v19, %v1466_v17  ;;  %v1490_v22 = vadd.f32 %v1489_v20, %v1488_v18  ;;  %v1469_v23 = vpop.f32.mrb[6].mxu1  ;;  %v1491_v24 = vpop.f32.mrb[10].mxu0 }
 0x31a   : > { %v1470_v25 = vpop.f32.mrb[7].mxu1  ;;  %v1492_v26 = vpop.f32.mrb[11].mxu0 }
 0x31b   : > { %v1214_v27 = vadd.f32 %v1490_v22, %v1468_v21 }
 0x31d   : > { %1219 = vst [vmem:[%s310_s20] sm:$0xff] %v1214_v27 }
 0x31e   : > { %1836 = shalt.err (!%p1833_p4)
}
 0x31f   : > { %s1837_s26 = scalar_lea.hbm %s2177_s10, 128  ;;  %s1841_s7 = scalar_lea.hbm %s2227_s6, 256 }
 0x320   : > { %p1838_p0 = scmp.ne.s32.totalorder %s2177_s10, %s1837_s26  ;;  %p1842_p8 = scmp.lt.u32.totalorder %s2177_s10, %s2227_s6 }
 0x321   : > { %p1843_p13 = scmp.lt.u32.totalorder %s1841_s7, %s1837_s26  ;;  %p1845_p10 = scmp.lt.u32.totalorder %s1837_s26, %s2177_s10 }
 0x322   : > { %p1839_p9 = pnand %p1838_p0, %p2088_p5 }
 0x323   : > { %p1844_p6 = por %p1843_p13, %p1842_p8 }
 0x324   : > { %p1840_p11 = pneg %p1839_p9 }
 0x325   : > { %p1846_p3 = por %p1845_p10, %p1844_p6 }
 0x327   : > { %p1847_p7 = pnand %p1846_p3, %p1840_p11 }
 0x329   : > { %1850 = shalt.err (!%p1847_p7)
}
 0x32a   : > { %1508 = dma.vmem_to_hbm [thread:$0]  (%p2088_p5), %s2179_s17, 128, %s2177_s10, %s1221_s25  }
 0x32b PF: > { %s1246_s20 = sand.u32 1, %s1885_s21   ;;  %p2245_p12 = scmp.ne.s32.totalorder %s2232_s28, 0 }
 0x32c   : > { %p2246_p2 = scmp.ge.s32.totalorder %s1897_s24, 2  ;;  %s1247_s8 = scalar_lea.sflag [#allocation4], %s1246_s20 }
 0x32e   : > { %p1525_p1 = pnand %p2246_p2, %p2245_p12 }
 0x330   : > { %1880 = dma.done.wait (!%p1525_p1), %s1247_s8, 128  }
 0x331   : > { %1882 = vsyncadd (!%p1525_p1), %s1247_s8, 4294967168  ;;  %p21_p4 = scmp.ge.s32.totalorder %s2074_s30, 4   ;;  %s2247_s21 = smov %s1889_s22 }
 0x332   : > { %s2248_s22 = smov %s1893_s23  ;;  %s2249_s23 = smov %s2084_s13 }
 0x333   : > { %s2250_s24 = smov %s2074_s30  ;;  %23 = sbr.rel (!%p21_p4) target bundleno = 7 (0x7), region = 101 }
 0x33a   :  { %1252 = vsyncpa [#allocation3], 1 }
 0x33b   :  { %1254 = vsyncpa [#allocation3 + $0x1], 1 }
 0x33c   :  { %1255 = vsyncpa [#allocation6], 1 }
 0x33d   :  { %1256 = vsyncpa [#allocation9], 1 }
 0x33e   :  { %1257 = vsyncpa [#allocation4], 1 }
 0x33f   :  { %1259 = vsyncpa [#allocation4 + $0x1], 1 }

</bundles_post_ra>
